<compile_context>
chip_gen: v7x
topology: tpu7x:2x2x1
jax: 0.10.0
libtpu: 0.0.40
codegen_flags: <defaults>
</compile_context>

<pallas_src>
import jax
import jax.numpy as jnp
from jax.experimental import pallas as pl
from jax.experimental.pallas import tpu as pltpu


# ---------------------------------------------------------------------------
# Kernel body
# ---------------------------------------------------------------------------
def _gather_cast_kernel(sel_ref, feats_ref, out_ref):
    # sel_ref:   SMEM scalar-prefetch ref holding [index, layer_id]; it is consumed by
    #            the index_maps (item/layer block selection) and unused in the body.
    # feats_ref: VMEM tile of the selected (item, layer) -> (time_tile, D), source dtype.
    # out_ref:   VMEM tile of the output                 -> (time_tile, D), output dtype.
    del sel_ref
    out_ref[...] = feats_ref[...].astype(out_ref.dtype)


# ---------------------------------------------------------------------------
# Tile sizing helpers
# ---------------------------------------------------------------------------
def _round_up(x, m):
    return ((x + m - 1) // m) * m


def _min_sublane(dtype) -> int:
    """Minimum sublane tile rows: 8 for 4-byte dtypes, 16 for bf16, 32 for int8/fp8."""
    itemsize = jnp.dtype(dtype).itemsize
    return 8 * max(1, 4 // itemsize)


def _choose_time_tile(T, D, in_dtype, out_dtype, *, target_steps=4,
                      max_tile_rows=1024, min_step_bytes=1 << 20):
    """Pick a sublane-aligned time tile such that:
      * large T gets ~target_steps grid steps (step i+1's read DMA overlaps step i's
        cast/writeback, and the "parallel" time axis shards across v7x's 2 TCs);
      * per-step HBM traffic stays >= ~1 MiB (tiny tiles fall off the roofline on
        v7x's 3.2 TB/s behind the ~0.35us/step overhead);
      * the tile never exceeds max_tile_rows, so huge T can't collapse to one block.
    """
    sub = _min_sublane(in_dtype)
    in_bytes = jnp.dtype(in_dtype).itemsize
    out_bytes = jnp.dtype(out_dtype).itemsize
    row_bytes = D * (in_bytes + out_bytes)  # bytes moved (read + write) per time row

    if T <= 2 * sub:
        # Tiny clip: single full block (block dim == full array dim, so the sublane
        # divisibility constraint does not apply even for odd T).
        return T

    def align_up(x):
        return ((x + sub - 1) // sub) * sub

    tile = align_up((T + target_steps - 1) // target_steps)                    # ~4 steps
    tile = max(tile, align_up((min_step_bytes + row_bytes - 1) // row_bytes))  # BW floor
    tile = min(tile, align_up(max_tile_rows))                                  # pipe cap
    tile = min(tile, T)

    if tile >= T:
        return T

    # Prefer an aligned divisor of T near the chosen tile (avoids a masked-store partial
    # final block), but never shrink below half the target tile; otherwise accept the
    # partial last block (correct; only its store path is masked).
    lo = max(sub, (tile // 2 // sub) * sub)
    for cand in range(tile, lo - 1, -sub):
        if T % cand == 0:
            return cand
    return tile


# ---------------------------------------------------------------------------
# Forward wrapper (== AVESBio.forward(index) with fixed layer_id)
# ---------------------------------------------------------------------------
def aves_bio_forward(feature_table, index, layer_id, *, time_tile=None,
                     out_dtype=jnp.float32, prefer_xla=False, force_pallas=False):
    """feature_table: [N_ITEMS, N_LAYERS, T, D] (any <=4-byte float/int dtype)
    index, layer_id: python ints or scalar ints
    returns: [1, T, D] `out_dtype` (float32 by default, matching torch.FloatTensor).
    Set out_dtype=jnp.bfloat16 if the consumer accepts bf16 (drops ~1/3 of HBM traffic).
    """
    n_items, n_layers, T, D = feature_table.shape
    in_dtype = feature_table.dtype
    in_bytes = jnp.dtype(in_dtype).itemsize
    out_bytes = jnp.dtype(out_dtype).itemsize

    # Bounds-guard the scalar selectors before they can drive a DMA. (The PyTorch dict
    # lookup would raise; clipping is applied identically on both paths here so OOB
    # behaviour is consistent.)
    idx = jnp.clip(jnp.asarray(index, jnp.int32), 0, n_items - 1)
    lid = jnp.clip(jnp.asarray(layer_id, jnp.int32), 0, n_layers - 1)

    # XLA fast path: the op is a pure gather (+ optional cast). When no cast is needed,
    # when the caller prefers fusing the convert into a downstream XLA consumer, or for
    # 8-byte dtypes (no sane TPU sublane tiling), a plain slice+convert moves the same
    # bytes with zero pallas_call launch/pipeline overhead.
    if not force_pallas and (prefer_xla or in_dtype == jnp.dtype(out_dtype) or in_bytes > 4):
        return feature_table[idx, lid].astype(out_dtype)[None]

    if time_tile is None:
        time_tile = _choose_time_tile(T, D, in_dtype, out_dtype)
    num_steps = max(1, (T + time_tile - 1) // time_tile)

    # 3-deep input buffering only when there is a pipeline to fill (>=3 steps); the
    # kernel has ~zero compute per step, so DMA latency jitter is otherwise exposed.
    use_deep_buffer = num_steps >= 3
    buffer_count = 3 if use_deep_buffer else 2

    # VMEM limit derived from the actual multi-buffered footprint (+ slack) instead of a
    # blanket 32 MiB: leaves scoped VMEM for neighbouring fusions on v5e (16 MiB scoped
    # default) and stays well clear of v7x's 64 MiB physical VMEM.
    in_buf_bytes = buffer_count * time_tile * D * in_bytes
    out_buf_bytes = 2 * time_tile * D * out_bytes
    vmem_limit = int((in_buf_bytes + out_buf_bytes) * 1.25) + (1 << 20)
    vmem_limit = min(48 << 20, max(4 << 20, _round_up(vmem_limit, 1 << 20)))

    sel = jnp.stack([idx, lid])  # scalar-prefetched selector -> SMEM

    cost = pl.CostEstimate(
        flops=0, transcendentals=0, bytes_accessed=T * D * (in_bytes + out_bytes)
    )

    in_spec_kwargs = {}
    if use_deep_buffer:
        in_spec_kwargs["pipeline_mode"] = pl.Buffered(buffer_count)

    in_spec = pl.BlockSpec(
        # Pick the (item, layer) block from the scalar-prefetched selector; squeeze
        # those two singleton dims so the kernel sees a lane-dense (time_tile, D) tile.
        (pl.Squeezed(), pl.Squeezed(), time_tile, D),
        lambda t, sel_ref: (sel_ref[0], sel_ref[1], t, 0),
        **in_spec_kwargs,
    )

    grid_spec = pltpu.PrefetchScalarGridSpec(
        num_scalar_prefetch=1,
        grid=(num_steps,),
        in_specs=[in_spec],
        # Rank-2, lane-dense output tile; the batch unsqueeze happens in the wrapper.
        out_specs=pl.BlockSpec((time_tile, D), lambda t, sel_ref: (t, 0)),
    )

    out = pl.pallas_call(
        _gather_cast_kernel,
        out_shape=jax.ShapeDtypeStruct((T, D), out_dtype),
        grid_spec=grid_spec,
        compiler_params=pltpu.CompilerParams(
            # Time-tile iterations are independent -> shard across v7x's 2 TensorCores;
            # neutral on single-TC v5e/v6e.
            dimension_semantics=("parallel",),
            vmem_limit_bytes=vmem_limit,
        ),
        cost_estimate=cost,
    )(sel, feature_table)

    return out[None]  # [1, T, D]; wrapper-side reshape is a free metadata op


if __name__ == "__main__":
    # TODO(synk): the npz-file / Python-dict construction of AVESBio.__init__ has no
    # Pallas equivalent; the feature dict is modeled as a dense [N_ITEMS, N_LAYERS, T, D]
    # device array built in-script.
    key = jax.random.PRNGKey(0)
    k1, k2 = jax.random.split(key)

    # --- Case 1: small table (T=16, D=128), bf16 storage -> single-step kernel ---
    N_ITEMS, N_LAYERS, T, D = 3, 4, 16, 128
    base = jax.random.normal(k1, (N_ITEMS, N_LAYERS, T, D), dtype=jnp.float32)
    feats_bf16 = base.astype(jnp.bfloat16)
    index, layer_id = 1, 2

    out = jax.block_until_ready(aves_bio_forward(feats_bf16, index, layer_id))
    ref = feats_bf16[index, layer_id].astype(jnp.float32)[None]
    assert out.shape == (1, T, D), out.shape
    assert out.dtype == jnp.float32
    assert bool(jnp.allclose(out, ref)), "mismatch vs reference gather (bf16, small T)"

    # --- f32 fast path (no cast needed -> plain slice, no Pallas round-trip) ---
    out_f32 = jax.block_until_ready(aves_bio_forward(base, index, layer_id))
    ref_f32 = base[index, layer_id][None]
    assert out_f32.shape == (1, T, D) and out_f32.dtype == jnp.float32
    assert bool(jnp.allclose(out_f32, ref_f32)), "mismatch vs reference gather (f32 path)"

    # --- Case 2: long clip (T=4096) -> multi-step pipelined path
    #     (tile=1024 rows, 4 grid steps, Buffered(3) input, both TCs on v7x) ---
    T2 = 4096
    base2 = jax.random.normal(k2, (2, 2, T2, D), dtype=jnp.float32).astype(jnp.bfloat16)
    out2 = jax.block_until_ready(aves_bio_forward(base2, 0, 1))
    ref2 = base2[0, 1].astype(jnp.float32)[None]
    assert out2.shape == (1, T2, D) and out2.dtype == jnp.float32
    assert bool(jnp.allclose(out2, ref2)), "mismatch vs reference gather (bf16, long T)"

    print("KERNEL_OK")
</pallas_src>

<mosaic_0001>
module attributes {stable_mosaic.version = 11 : i64} {
  func.func @_gather_cast_kernel(%arg0: i32, %arg1: memref<2xi32, #tpu.memory_space<smem>>, %arg2: memref<1x1x16x128xbf16, #tpu.memory_space<vmem>>, %arg3: memref<16x128xf32, #tpu.memory_space<vmem>>) attributes {dimension_semantics = [#tpu.dimension_semantics<parallel>], iteration_bounds = array<i64: 1>, scalar_prefetch = 1 : i64, scratch_operands = 0 : i64, tpu.core_type = #tpu.core_type<tc>, window_params = [{transform_indices = @transform_0, window_bounds = array<i64: 1, 1, 16, 128>}, {transform_indices = @transform_1, window_bounds = array<i64: 16, 128>}]} {
    %c0 = arith.constant 0 : index
    %c0_0 = arith.constant 0 : index
    %c0_1 = arith.constant 0 : index
    %c0_2 = arith.constant 0 : index
    %0 = vector.load %arg2[%c0, %c0_0, %c0_1, %c0_2] : memref<1x1x16x128xbf16, #tpu.memory_space<vmem>>, vector<1x1x16x128xbf16>
    %1 = vector.shape_cast %0 : vector<1x1x16x128xbf16> to vector<16x128xbf16>
    %2 = arith.extf %1 : vector<16x128xbf16> to vector<16x128xf32>
    %c0_3 = arith.constant 0 : index
    %c0_4 = arith.constant 0 : index
    %3 = vector.load %arg3[%c0_3, %c0_4] : memref<16x128xf32, #tpu.memory_space<vmem>>, vector<16x128xf32>
    tpu.vector_store %arg3[%c0_3, %c0_4], %2 {strides = array<i32>} : memref<16x128xf32, #tpu.memory_space<vmem>>, vector<16x128xf32>,
    return
  }
  func.func @transform_0(%arg0: i32, %arg1: memref<2xi32, #tpu.memory_space<smem>>) -> (i32, i32, i32, i32) {
    %c0 = arith.constant 0 : index
    %0 = memref.load %arg1[%c0] : memref<2xi32, #tpu.memory_space<smem>>
    %c1 = arith.constant 1 : index
    %1 = memref.load %arg1[%c1] : memref<2xi32, #tpu.memory_space<smem>>
    %c0_i32 = arith.constant 0 : i32
    %c0_i32_0 = arith.constant 0 : i32
    return %0, %1, %arg0, %c0_i32 : i32, i32, i32, i32
  }
  func.func @transform_1(%arg0: i32, %arg1: memref<2xi32, #tpu.memory_space<smem>>) -> (i32, i32) {
    %c0_i32 = arith.constant 0 : i32
    %c0_i32_0 = arith.constant 0 : i32
    return %arg0, %c0_i32 : i32, i32
  }
}

</mosaic_0001>

<bundles_post_ra>
// kernel: tpu_custom_call.1
= control target key start
LH: loop header
LB: loop body
LE: loop exit
PB: predicated region body
PF: predicated region fallthrough
CT: control target
= control target key end

     0   :  { %s197_s0 = inlined_call_operand.hbm [shape: s32[2], index: 0, kind: input, shape index: {}]   ;;  %s198_s1 = inlined_call_operand.hbm [shape: bf16[3,4,16,128], index: 1, kind: input, shape index: {}]   ;;  %s199_s2 = inlined_call_operand.hbm [shape: f32[16,128], index: 2, kind: output, shape index: {}]  }
   0x1   :  { %s80_s11 = scalar_lea.hbm %s197_s0, 16 }
   0x2   :  { %p81_p0 = scmp.ne.s32.totalorder %s197_s0, %s80_s11  ;;  %p84_p1 = scmp.lt.u32.totalorder %s80_s11, %s197_s0 }
   0x4   :  { %p86_p2 = pnand %p84_p1, %p81_p0 }
   0x6   :  { %89 = shalt.err (!%p86_p2)  }
   0x7   :  { %s142_s16 = smov [#allocation3]  }
   0x8   :  { %8 = dma.hbm_to_smem %s197_s0, 16, %s142_s16, [#allocation2] }
   0x9   :  { %136 = dma.done.wait [#allocation2], 16 }
   0xa   :  { %137 = vsyncadd [#allocation2], 4294967280 }
   0xb   :  { %10 = sfence }
   0xc   :  { %11 = vsyncpa [#allocation5], 0 }
   0xd   :  { %12 = vsyncpa [#allocation6], 0  ;;  %s15_s19 = sld [smem:[#allocation3]]  ;;  %s65_s20 = sld [smem:[#allocation3 + $0x1]] }
   0xe   :  { %s143_s21 = smov [#allocation4]   ;;  %s92_s4 = scalar_lea.hbm %s198_s1, 1536 }
   0xf   :  { %s25_s22 = sshll.u32 %s143_s21, 4  ;;  %s26_s22 = int_to_ptr.vmem [resolvable:$true] %s25_s22 }
  0x13   :  { %s66_s23 = sshll.u32 %s65_s20, 1  ;;  %s67_s24 = sshll.u32 %s15_s19, 3 }
  0x14   :  { %s22_s25 = sadd.s32 %s67_s24, %s66_s23 }
  0x15   :  { %s68_s26 = sshll.u32 %s22_s25, 6 }
  0x16   :  { %s24_s29 = scalar_lea.hbm %s198_s1, %s68_s26 }
  0x17   :  { %s90_s30 = scalar_lea.hbm %s24_s29, 128  ;;  %p93_p4 = scmp.lt.u32.totalorder %s24_s29, %s198_s1 }
  0x18   :  { %p91_p3 = scmp.ne.s32.totalorder %s24_s29, %s90_s30  ;;  %p94_p5 = scmp.lt.u32.totalorder %s92_s4, %s90_s30 }
  0x19   :  { %p96_p7 = scmp.lt.u32.totalorder %s90_s30, %s24_s29 }
  0x1a   :  { %p95_p6 = por %p94_p5, %p93_p4 }
  0x1c   :  { %p97_p8 = por %p96_p7, %p95_p6 }
  0x1e   :  { %p98_p9 = pnand %p97_p8, %p91_p3 }
  0x20   :  { %101 = shalt.err (!%p98_p9)
}
  0x21   :  { %s102_s7 = scalar_lea.vmem %s26_s22, 128  ;;  %p107_p11 = scmp.lt.s32.totalorder %s26_s22, %s26_s22 }
  0x22   :  { %p103_p10 = scmp.ne.s32.totalorder %s26_s22, %s102_s7  ;;  %p108_p12 = scmp.lt.s32.totalorder %s102_s7, %s102_s7 }
  0x24   :  { %p109_p13 = por %p108_p12, %p107_p11 }
  0x26   :  { %p110_p0 = pnand %p109_p13, %p103_p10 }
  0x28   :  { %113 = shalt.err (!%p110_p0)
}
  0x29   :  { %s144_s8 = smov 64   ;;  %s145_s9 = smov 4  }
  0x2a   :  { %31 = dma.hbm_to_vmem [thread:$0]  %s24_s29, 128, %s26_s22, [#allocation5], %s144_s8, %s144_s8, %s145_s9  }
  0x2b   :  { %138 = dma.done.wait [#allocation5], 128  }
  0x2c   :  { %139 = vsyncadd [#allocation5], 4294967168  ;;  %s146_s10 = smov [#allocation7]   ;;  %v70_v0 = vld [vmem:[#allocation4] sm:$0xff]  }
  0x2d   :  { %s48_s1 = sshll.u32 %s146_s10, 4  ;;  %v71_v1 = vunpack.c.l.bf16 %v70_v0  ;;  %v72_v2 = vunpack.c.h.bf16 %v70_v0  ;;  %s49_s1 = int_to_ptr.vmem [resolvable:$true] %s48_s1 }
  0x2e   :  { %s114_s11 = scalar_lea.vmem %s49_s1, 256  ;;  %p119_p2 = scmp.lt.s32.totalorder %s49_s1, %s49_s1 }
  0x2f   :  { %41 = vst [vmem:[#allocation7] sm:$0xff] %v71_v1  ;;  %42 = vst [vmem:[#allocation7 + $0x8] sm:$0xff] %v72_v2  ;;  %p115_p1 = scmp.ne.s32.totalorder %s49_s1, %s114_s11  ;;  %p120_p3 = scmp.lt.s32.totalorder %s114_s11, %s114_s11 }
  0x31   :  { %p121_p4 = por %p120_p3, %p119_p2 }
  0x33   :  { %p122_p5 = pnand %p121_p4, %p115_p1 }
  0x35   :  { %125 = shalt.err (!%p122_p5)
}
  0x36   :  { %s126_s14 = scalar_lea.hbm %s199_s2, 256 }
  0x37   :  { %p127_p6 = scmp.ne.s32.totalorder %s199_s2, %s126_s14  ;;  %p130_p7 = scmp.lt.u32.totalorder %s126_s14, %s199_s2 }
  0x39   :  { %p132_p8 = pnand %p130_p7, %p127_p6 }
  0x3b   :  { %135 = shalt.err (!%p132_p8)
}
  0x3c   :  { %s147_s19 = smov 128   ;;  %s148_s20 = smov 8  }
  0x3d   :  { %54 = dma.vmem_to_hbm [thread:$0]  %s49_s1, 256, %s199_s2, [#allocation6], %s147_s19, %s147_s19, %s148_s20  }
  0x3e   :  { %140 = dma.done.wait [#allocation6], 256  }
  0x3f   :  { %141 = vsyncadd [#allocation6], 4294967040 }
  0x40   :  { %58 = vsyncpa [#allocation5], 1 }
  0x41   :  { %59 = vsyncpa [#allocation6], 1 }

</bundles_post_ra>
